<compile_context>
chip_gen: v6e
topology: v6e:2x2x1
jax: 0.10.0
libtpu: 0.0.40
codegen_flags: <defaults>
</compile_context>

<pallas_src>
import functools

import jax
import jax.numpy as jnp
from jax.experimental import pallas as pl
from jax.experimental.pallas import tpu as pltpu


# --------------------------------------------------------------------------------
# Kernel
# --------------------------------------------------------------------------------
def _fused_seg_loss_kernel(pred_ref, aux_ref, teacher_ref,          # inputs
                           ce_out_ref, dice_out_ref,                # outputs
                           inter_m_acc, den_m_acc,                  # scratch
                           inter_a_acc, den_a_acc,
                           ce_m_acc, ce_a_acc,
                           *, hw_actual, needs_mask, one_hot_teacher):
    """Grid = (B, hw_chunks, n_hw).  Blocks are (1, C, S, 128) pixels.

    Accumulates lane/sublane-partial sums across the (sequential) hw axis and
    finalizes once per (batch, hw-chunk):
      ce_out[b, p, 0, 0] = sum over valid pixels of CE(pred)
      ce_out[b, p, 0, 1] = sum over valid pixels of CE(aux_pred)
      dice_out[b, p, c, 0:4] = [sum(pred*teach), sum(pred)+sum(teach),
                                sum(aux*teach),  sum(aux)+sum(teach)]  (per channel)
    """
    h = pl.program_id(2)
    n_h = pl.num_programs(2)

    @pl.when(h == 0)
    def _():
        inter_m_acc[...] = jnp.zeros_like(inter_m_acc)
        den_m_acc[...] = jnp.zeros_like(den_m_acc)
        inter_a_acc[...] = jnp.zeros_like(inter_a_acc)
        den_a_acc[...] = jnp.zeros_like(den_a_acc)
        ce_m_acc[...] = jnp.zeros_like(ce_m_acc)
        ce_a_acc[...] = jnp.zeros_like(ce_a_acc)

    pred_n = pred_ref[0]        # (C, S, 128) native dtype
    aux_n = aux_ref[0]
    teach_n = teacher_ref[0]
    C, S, _ = pred_n.shape
    n_grp = S // 8              # number of (8,128) vreg rows along the pixel axis

    # Upcast inside the kernel (HBM traffic stays in the native dtype).
    pred = pred_n.astype(jnp.float32)
    aux = aux_n.astype(jnp.float32)
    teach = teach_n.astype(jnp.float32)

    prod_m = pred * teach       # shared by dice intersection and the one-hot CE sel
    prod_a = aux * teach

    # ---- helpers: pure-VPU partial reductions (no per-tile cross-lane work) ----
    def reduce_c(x, op):
        """Reduce over the channel axis of (C, S, 128) -> (S, 128): slab-wise ops."""
        acc = x[0]
        for c in range(1, x.shape[0]):
            acc = op(acc, x[c])
        return acc

    def grp_sum3(x):
        """(C, S, 128) -> (C, 8, 128): add vreg rows together (static slices)."""
        acc = x[:, 0:8, :]
        for g in range(1, n_grp):
            acc = acc + x[:, g * 8:(g + 1) * 8, :]
        return acc

    def grp_sum2(x):
        """(S, 128) -> (8, 128)."""
        acc = x[0:8, :]
        for g in range(1, n_grp):
            acc = acc + x[g * 8:(g + 1) * 8, :]
        return acc

    # ---- dice lane-partial accumulators (zero padding contributes exactly 0) ----
    g_teach = grp_sum3(teach)                       # shared by both denominators
    inter_m_acc[...] += grp_sum3(prod_m)
    inter_a_acc[...] += grp_sum3(prod_a)
    den_m_acc[...] += grp_sum3(pred) + g_teach
    den_a_acc[...] += grp_sum3(aux) + g_teach

    # ---- CE: per-pixel logsumexp_c - selected logit ----
    def logsumexp_c(x):                             # (C, S, 128) -> (S, 128)
        m = reduce_c(x, jnp.maximum)
        e = jnp.exp(x - m[None])
        return jnp.log(reduce_c(e, jnp.add)) + m

    if one_hot_teacher:
        # Fast path: teacher rows are one-hot -> selected logit = sum_c teach*logit.
        sel_m = reduce_c(prod_m, jnp.add)
        sel_a = reduce_c(prod_a, jnp.add)
    else:
        # General path: first-max argmax over channels (compares in input dtype).
        c_iota = jax.lax.broadcasted_iota(jnp.int32, teach_n.shape, 0)   # (C,S,128)
        t_max = reduce_c(teach_n, jnp.maximum)                           # (S,128)
        cand = jnp.where(teach_n == t_max[None], c_iota, C)
        amax = reduce_c(cand, jnp.minimum)                               # (S,128)
        sel_mask = c_iota == amax[None]
        sel_m = reduce_c(jnp.where(sel_mask, pred, 0.0), jnp.add)
        sel_a = reduce_c(jnp.where(sel_mask, aux, 0.0), jnp.add)

    ce_m_vals = logsumexp_c(pred) - sel_m           # (S, 128)
    ce_a_vals = logsumexp_c(aux) - sel_a

    if needs_mask:
        # Mask out the zero-padded tail of H*W (padded logsumexp = log C != 0).
        base = (pl.program_id(1) * n_h + h) * (S * 128)
        pix = (base
               + jax.lax.broadcasted_iota(jnp.int32, (S, 128), 0) * 128
               + jax.lax.broadcasted_iota(jnp.int32, (S, 128), 1))
        valid = pix < hw_actual
        ce_m_vals = jnp.where(valid, ce_m_vals, 0.0)
        ce_a_vals = jnp.where(valid, ce_a_vals, 0.0)

    ce_m_acc[...] += grp_sum2(ce_m_vals)
    ce_a_acc[...] += grp_sum2(ce_a_vals)

    # ---- finalize once per (batch, hw-chunk): the only cross-lane reductions ----
    @pl.when(h == n_h - 1)
    def _():
        def per_channel(acc_ref):                   # (C, 8, 128) -> (C, 1)
            s = jnp.sum(acc_ref[...], axis=-1)      # (C, 8)
            return jnp.sum(s, axis=-1, keepdims=True)

        i_m = per_channel(inter_m_acc)
        d_m = per_channel(den_m_acc)
        i_a = per_channel(inter_a_acc)
        d_a = per_channel(den_a_acc)
        lane4 = jax.lax.broadcasted_iota(jnp.int32, dice_out_ref.shape, 3)
        dice_out_ref[...] = (jnp.where(lane4 == 0, i_m, 0.0)
                             + jnp.where(lane4 == 1, d_m, 0.0)
                             + jnp.where(lane4 == 2, i_a, 0.0)
                             + jnp.where(lane4 == 3, d_a, 0.0))

        ce_m = jnp.sum(ce_m_acc[...], keepdims=True)       # (1, 1)
        ce_a = jnp.sum(ce_a_acc[...], keepdims=True)
        lane = jax.lax.broadcasted_iota(jnp.int32, ce_out_ref.shape, 3)
        ce_out_ref[...] = (jnp.where(lane == 0, ce_m, 0.0)
                           + jnp.where(lane == 1, ce_a, 0.0))


# --------------------------------------------------------------------------------
# Tiling / VMEM budgeting helpers
# --------------------------------------------------------------------------------
def _round_up(x, m):
    return ((x + m - 1) // m) * m


def _vmem_capacity_bytes():
    """Physical VMEM on this generation; conservative (v7x-sized) fallback."""
    try:
        return int(pltpu.get_tpu_info().vmem_capacity_bytes)
    except Exception:
        return 64 << 20


def _choose_hw_tile(hw, num_ch, in_bytes, vmem_budget_bytes, cap=32768):
    """Largest multiple of 1024 pixels <= cap whose per-step footprint
    (3 double-buffered input blocks + ~8 f32 in-tile temporaries) fits the budget."""
    cap = max(1024, (cap // 1024) * 1024)
    per_px = num_ch * (3 * 2 * in_bytes + 8 * 4) + 8 * 4
    t = min(cap, _round_up(hw, 1024))
    while t > 1024 and t * per_px > vmem_budget_bytes:
        t -= 1024
    return t


# --------------------------------------------------------------------------------
# pallas_call wrapper
# --------------------------------------------------------------------------------
def _fused_seg_loss_sums(pred, aux, teacher, *, hw_actual, t_hw, hw_chunks,
                         one_hot_teacher, vmem_limit_bytes):
    """pred/aux/teacher: (B, C, S_total, 128) zero-padded along pixels.

    Returns (ce_out (B, P, 8, 128), dice_out (B, P, C, 128)) partial sums."""
    B, C, S_total, _ = pred.shape
    S = t_hw // 128
    n_hw_total = S_total // S
    P = hw_chunks
    n_hw = n_hw_total // P

    kernel = functools.partial(
        _fused_seg_loss_kernel,
        hw_actual=int(hw_actual),
        needs_mask=(S_total * 128 != hw_actual),
        one_hot_teacher=bool(one_hot_teacher))

    in_spec = pl.BlockSpec((1, C, S, 128), lambda b, p, h: (b, 0, p * n_hw + h, 0))

    return pl.pallas_call(
        kernel,
        out_shape=(jax.ShapeDtypeStruct((B, P, 8, 128), jnp.float32),
                   jax.ShapeDtypeStruct((B, P, C, 128), jnp.float32)),
        grid_spec=pltpu.PrefetchScalarGridSpec(
            num_scalar_prefetch=0,
            grid=(B, P, n_hw),
            in_specs=[in_spec, in_spec, in_spec],
            out_specs=(pl.BlockSpec((1, 1, 8, 128), lambda b, p, h: (b, p, 0, 0)),
                       pl.BlockSpec((1, 1, C, 128), lambda b, p, h: (b, p, 0, 0))),
            scratch_shapes=[
                pltpu.VMEM((C, 8, 128), jnp.float32),   # intersection (main)
                pltpu.VMEM((C, 8, 128), jnp.float32),   # pred_sum + teacher_sum (main)
                pltpu.VMEM((C, 8, 128), jnp.float32),   # intersection (aux)
                pltpu.VMEM((C, 8, 128), jnp.float32),   # pred_sum + teacher_sum (aux)
                pltpu.VMEM((8, 128), jnp.float32),      # CE partial (main)
                pltpu.VMEM((8, 128), jnp.float32),      # CE partial (aux)
            ]),
        compiler_params=pltpu.CompilerParams(
            # batch and hw-chunk rows are independent (distinct output blocks) so
            # megacore can shard them; the hw-reduction axis stays sequential.
            dimension_semantics=("parallel", "parallel", "arbitrary"),
            vmem_limit_bytes=int(vmem_limit_bytes)),
    )(pred, aux, teacher)


def auxiliary_segmentation_loss(pred, auxiliary_pred, teacher,
                                loss_type="ce+dice", auxiliary_loss_weight=0.4,
                                smooth=1.0, hw_tile_cap=32768, hw_chunks=1,
                                one_hot_teacher=True):
    """Mirrors AuxiliarySegmentationLoss.forward (no learnable params).

    one_hot_teacher=True uses the fast CE path (selected logit = sum_c teach*logit);
    set it to False for soft / non-one-hot teachers to reproduce torch.argmax exactly.
    hw_chunks>1 splits the pixel reduction across a second parallel grid axis
    (useful on v7x with batch 1-2 so both TensorCores get work)."""
    assert pred.ndim == 4 and auxiliary_pred.ndim == 4 and teacher.ndim == 4
    assert pred.shape == auxiliary_pred.shape == teacher.shape
    assert hw_chunks >= 1
    B, C, H, W = pred.shape
    HW = H * W
    in_bytes = jnp.dtype(pred.dtype).itemsize

    phys_vmem = _vmem_capacity_bytes()
    vmem_limit = (phys_vmem * 3) // 4
    t_hw = _choose_hw_tile(HW, C, in_bytes, vmem_limit - (4 << 20), cap=hw_tile_cap)
    chunk = t_hw * hw_chunks
    hw_pad = _round_up(HW, chunk)

    def prep(x):
        x = x.reshape(B, C, HW)
        if hw_pad != HW:
            x = jnp.pad(x, ((0, 0), (0, 0), (0, hw_pad - HW)))
        return x.reshape(B, C, hw_pad // 128, 128)

    ce_out, dice_out = _fused_seg_loss_sums(
        prep(pred), prep(auxiliary_pred), prep(teacher),
        hw_actual=HW, t_hw=t_hw, hw_chunks=hw_chunks,
        one_hot_teacher=one_hot_teacher, vmem_limit_bytes=vmem_limit)

    # CE: F.cross_entropy(reduction='mean') over all B*H*W pixels.
    ce_m = jnp.sum(ce_out[:, :, 0, 0]) / (B * H * W)
    ce_a = jnp.sum(ce_out[:, :, 0, 1]) / (B * H * W)

    # Dice: combine per-chunk partial sums exactly, then .mean((1,)).mean((0,)).
    dp = jnp.sum(dice_out[:, :, :, :4], axis=1)              # (B, C, 4)
    dice_m = jnp.mean(1.0 - (2.0 * dp[..., 0] + smooth) / (dp[..., 1] + smooth))
    dice_a = jnp.mean(1.0 - (2.0 * dp[..., 2] + smooth) / (dp[..., 3] + smooth))

    lt = loss_type.lower()

    def typed(ce, dc):
        if lt == "ce+dice":
            return ce + dc
        if lt == "ce":
            return ce
        if lt == "dice":
            return dc
        raise ValueError(f"invalid loss_type {loss_type}")

    return typed(ce_m, dice_m) + typed(ce_a, dice_a) * auxiliary_loss_weight


# --------------------------------------------------------------------------------
# Pure-JAX reference (sanity check)
# --------------------------------------------------------------------------------
def _ref_loss(pred, aux, teacher, loss_type="ce+dice", w=0.4, smooth=1.0):
    def ce(p, t):
        tgt = jnp.argmax(t, axis=1)
        logp = jax.nn.log_softmax(p, axis=1)
        sel = jnp.take_along_axis(logp, tgt[:, None], axis=1)[:, 0]
        return -jnp.mean(sel)

    def dice(p, t):
        inter = jnp.sum(p * t, axis=(-1, -2))
        ps = jnp.sum(p.reshape(p.shape[0], p.shape[1], -1), axis=-1)
        ts = jnp.sum(t.reshape(t.shape[0], t.shape[1], -1), axis=-1)
        return jnp.mean(1.0 - (2.0 * inter + smooth) / (ps + ts + smooth))

    def typed(p, t):
        if loss_type == "ce+dice":
            return ce(p, t) + dice(p, t)
        return ce(p, t) if loss_type == "ce" else dice(p, t)

    return typed(pred, teacher) + w * typed(aux, teacher)


if __name__ == "__main__":
    def make_inputs(B, C, H, W, dtype=jnp.float32):
        k1, k2, k3 = jax.random.split(jax.random.PRNGKey(0), 3)
        p = jax.random.normal(k1, (B, C, H, W), dtype=jnp.float32).astype(dtype)
        a = jax.random.normal(k2, (B, C, H, W), dtype=jnp.float32).astype(dtype)
        cls = jax.random.randint(k3, (B, H, W), 0, C)
        t = jax.nn.one_hot(cls, C, axis=1, dtype=jnp.float32).astype(dtype)
        return p, a, t

    checks = []

    # 1) default config (one-hot fast path); HW=256 -> padded to 1024 + masked tail
    p, a, t = make_inputs(2, 4, 16, 16)
    ref = _ref_loss(p, a, t)
    checks.append(("default", jax.block_until_ready(
        auxiliary_segmentation_loss(p, a, t)), ref, 1e-5))

    # 2) general argmax path (one_hot_teacher=False)
    checks.append(("argmax-path", jax.block_until_ready(
        auxiliary_segmentation_loss(p, a, t, one_hot_teacher=False)), ref, 1e-5))

    # 3) two HW chunks (second parallel grid axis, v7x dual-TC pattern)
    checks.append(("hw_chunks=2", jax.block_until_ready(
        auxiliary_segmentation_loss(p, a, t, hw_chunks=2)), ref, 1e-5))

    # 4) odd spatial size: non-multiple-of-128 HW -> padded + masked tail
    p4, a4, t4 = make_inputs(2, 4, 13, 13)
    checks.append(("odd-hw", jax.block_until_ready(
        auxiliary_segmentation_loss(p4, a4, t4)), _ref_loss(p4, a4, t4), 1e-5))

    # 5) HW exactly one tile: no padding / mask-free code path
    p5, a5, t5 = make_inputs(2, 4, 32, 32)
    checks.append(("no-pad", jax.block_until_ready(
        auxiliary_segmentation_loss(p5, a5, t5)), _ref_loss(p5, a5, t5), 1e-5))

    # 6) bf16 inputs streamed natively and upcast inside the kernel
    p6, a6, t6 = make_inputs(2, 4, 16, 16, dtype=jnp.bfloat16)
    ref6 = _ref_loss(p6.astype(jnp.float32), a6.astype(jnp.float32),
                     t6.astype(jnp.float32))
    checks.append(("bf16", jax.block_until_ready(
        auxiliary_segmentation_loss(p6, a6, t6)), ref6, 1e-3))

    for name, got, want, tol in checks:
        assert jnp.allclose(got, want, atol=tol, rtol=tol), (name, got, want)

    print("KERNEL_OK")
</pallas_src>

<mosaic_0001>
module attributes {stable_mosaic.version = 11 : i64} {
  func.func @_fused_seg_loss_kernel(%arg0: i32, %arg1: i32, %arg2: i32, %arg3: memref<1x4x8x128xf32, #tpu.memory_space<vmem>>, %arg4: memref<1x4x8x128xf32, #tpu.memory_space<vmem>>, %arg5: memref<1x4x8x128xf32, #tpu.memory_space<vmem>>, %arg6: memref<1x1x8x128xf32, #tpu.memory_space<vmem>>, %arg7: memref<1x1x4x128xf32, #tpu.memory_space<vmem>>, %arg8: memref<4x8x128xf32, #tpu.memory_space<vmem>>, %arg9: memref<4x8x128xf32, #tpu.memory_space<vmem>>, %arg10: memref<4x8x128xf32, #tpu.memory_space<vmem>>, %arg11: memref<4x8x128xf32, #tpu.memory_space<vmem>>, %arg12: memref<8x128xf32, #tpu.memory_space<vmem>>, %arg13: memref<8x128xf32, #tpu.memory_space<vmem>>) attributes {dimension_semantics = [#tpu.dimension_semantics<parallel>, #tpu.dimension_semantics<parallel>, #tpu.dimension_semantics<arbitrary>], iteration_bounds = array<i64: 2, 1, 1>, scalar_prefetch = 0 : i64, scratch_operands = 6 : i64, tpu.core_type = #tpu.core_type<tc>, window_params = [{transform_indices = @transform_0, window_bounds = array<i64: 1, 4, 8, 128>}, {transform_indices = @transform_1, window_bounds = array<i64: 1, 4, 8, 128>}, {transform_indices = @transform_2, window_bounds = array<i64: 1, 4, 8, 128>}, {transform_indices = @transform_3, window_bounds = array<i64: 1, 1, 8, 128>}, {transform_indices = @transform_4, window_bounds = array<i64: 1, 1, 4, 128>}]} {
    %c0_i32 = arith.constant 0 : i32
    %0 = arith.cmpi eq, %arg2, %c0_i32 : i32
    %1 = arith.extui %0 : i1 to i32
    %c0_i32_0 = arith.constant 0 : i32
    %2 = arith.cmpi ne, %1, %c0_i32_0 : i32
    scf.if %2 {
      %cst_47 = arith.constant 0.000000e+00 : f32
      %130 = vector.broadcast %cst_47 : f32 to vector<4x8x128xf32>
      %c0_48 = arith.constant 0 : index
      %c0_49 = arith.constant 0 : index
      %c0_50 = arith.constant 0 : index
      %131 = vector.load %arg8[%c0_48, %c0_49, %c0_50] : memref<4x8x128xf32, #tpu.memory_space<vmem>>, vector<4x8x128xf32>
      tpu.vector_store %arg8[%c0_48, %c0_49, %c0_50], %130 {strides = array<i32>} : memref<4x8x128xf32, #tpu.memory_space<vmem>>, vector<4x8x128xf32>,
      %cst_51 = arith.constant 0.000000e+00 : f32
      %132 = vector.broadcast %cst_51 : f32 to vector<4x8x128xf32>
      %c0_52 = arith.constant 0 : index
      %c0_53 = arith.constant 0 : index
      %c0_54 = arith.constant 0 : index
      %133 = vector.load %arg9[%c0_52, %c0_53, %c0_54] : memref<4x8x128xf32, #tpu.memory_space<vmem>>, vector<4x8x128xf32>
      tpu.vector_store %arg9[%c0_52, %c0_53, %c0_54], %132 {strides = array<i32>} : memref<4x8x128xf32, #tpu.memory_space<vmem>>, vector<4x8x128xf32>,
      %cst_55 = arith.constant 0.000000e+00 : f32
      %134 = vector.broadcast %cst_55 : f32 to vector<4x8x128xf32>
      %c0_56 = arith.constant 0 : index
      %c0_57 = arith.constant 0 : index
      %c0_58 = arith.constant 0 : index
      %135 = vector.load %arg10[%c0_56, %c0_57, %c0_58] : memref<4x8x128xf32, #tpu.memory_space<vmem>>, vector<4x8x128xf32>
      tpu.vector_store %arg10[%c0_56, %c0_57, %c0_58], %134 {strides = array<i32>} : memref<4x8x128xf32, #tpu.memory_space<vmem>>, vector<4x8x128xf32>,
      %cst_59 = arith.constant 0.000000e+00 : f32
      %136 = vector.broadcast %cst_59 : f32 to vector<4x8x128xf32>
      %c0_60 = arith.constant 0 : index
      %c0_61 = arith.constant 0 : index
      %c0_62 = arith.constant 0 : index
      %137 = vector.load %arg11[%c0_60, %c0_61, %c0_62] : memref<4x8x128xf32, #tpu.memory_space<vmem>>, vector<4x8x128xf32>
      tpu.vector_store %arg11[%c0_60, %c0_61, %c0_62], %136 {strides = array<i32>} : memref<4x8x128xf32, #tpu.memory_space<vmem>>, vector<4x8x128xf32>,
      %cst_63 = arith.constant 0.000000e+00 : f32
      %138 = vector.broadcast %cst_63 : f32 to vector<8x128xf32>
      %c0_64 = arith.constant 0 : index
      %c0_65 = arith.constant 0 : index
      %139 = vector.load %arg12[%c0_64, %c0_65] : memref<8x128xf32, #tpu.memory_space<vmem>>, vector<8x128xf32>
      tpu.vector_store %arg12[%c0_64, %c0_65], %138 {strides = array<i32>} : memref<8x128xf32, #tpu.memory_space<vmem>>, vector<8x128xf32>,
      %cst_66 = arith.constant 0.000000e+00 : f32
      %140 = vector.broadcast %cst_66 : f32 to vector<8x128xf32>
      %c0_67 = arith.constant 0 : index
      %c0_68 = arith.constant 0 : index
      %141 = vector.load %arg13[%c0_67, %c0_68] : memref<8x128xf32, #tpu.memory_space<vmem>>, vector<8x128xf32>
      tpu.vector_store %arg13[%c0_67, %c0_68], %140 {strides = array<i32>} : memref<8x128xf32, #tpu.memory_space<vmem>>, vector<8x128xf32>,
    } else {
    }
    %c0 = arith.constant 0 : index
    %c0_1 = arith.constant 0 : index
    %c0_2 = arith.constant 0 : index
    %c0_3 = arith.constant 0 : index
    %3 = vector.load %arg3[%c0, %c0_1, %c0_2, %c0_3] : memref<1x4x8x128xf32, #tpu.memory_space<vmem>>, vector<1x4x8x128xf32>
    %4 = vector.shape_cast %3 : vector<1x4x8x128xf32> to vector<4x8x128xf32>
    %c0_4 = arith.constant 0 : index
    %c0_5 = arith.constant 0 : index
    %c0_6 = arith.constant 0 : index
    %c0_7 = arith.constant 0 : index
    %5 = vector.load %arg4[%c0_4, %c0_5, %c0_6, %c0_7] : memref<1x4x8x128xf32, #tpu.memory_space<vmem>>, vector<1x4x8x128xf32>
    %6 = vector.shape_cast %5 : vector<1x4x8x128xf32> to vector<4x8x128xf32>
    %c0_8 = arith.constant 0 : index
    %c0_9 = arith.constant 0 : index
    %c0_10 = arith.constant 0 : index
    %c0_11 = arith.constant 0 : index
    %7 = vector.load %arg5[%c0_8, %c0_9, %c0_10, %c0_11] : memref<1x4x8x128xf32, #tpu.memory_space<vmem>>, vector<1x4x8x128xf32>
    %8 = vector.shape_cast %7 : vector<1x4x8x128xf32> to vector<4x8x128xf32>
    %9 = arith.mulf %4, %8 : vector<4x8x128xf32>
    %10 = arith.mulf %6, %8 : vector<4x8x128xf32>
    %c0_12 = arith.constant 0 : index
    %c0_13 = arith.constant 0 : index
    %c0_14 = arith.constant 0 : index
    %11 = vector.load %arg8[%c0_12, %c0_13, %c0_14] : memref<4x8x128xf32, #tpu.memory_space<vmem>>, vector<4x8x128xf32>
    %12 = arith.addf %11, %9 : vector<4x8x128xf32>
    %c0_15 = arith.constant 0 : index
    %c0_16 = arith.constant 0 : index
    %c0_17 = arith.constant 0 : index
    %13 = vector.load %arg8[%c0_15, %c0_16, %c0_17] : memref<4x8x128xf32, #tpu.memory_space<vmem>>, vector<4x8x128xf32>
    tpu.vector_store %arg8[%c0_15, %c0_16, %c0_17], %12 {strides = array<i32>} : memref<4x8x128xf32, #tpu.memory_space<vmem>>, vector<4x8x128xf32>,
    %c0_18 = arith.constant 0 : index
    %c0_19 = arith.constant 0 : index
    %c0_20 = arith.constant 0 : index
    %14 = vector.load %arg10[%c0_18, %c0_19, %c0_20] : memref<4x8x128xf32, #tpu.memory_space<vmem>>, vector<4x8x128xf32>
    %15 = arith.addf %14, %10 : vector<4x8x128xf32>
    %c0_21 = arith.constant 0 : index
    %c0_22 = arith.constant 0 : index
    %c0_23 = arith.constant 0 : index
    %16 = vector.load %arg10[%c0_21, %c0_22, %c0_23] : memref<4x8x128xf32, #tpu.memory_space<vmem>>, vector<4x8x128xf32>
    tpu.vector_store %arg10[%c0_21, %c0_22, %c0_23], %15 {strides = array<i32>} : memref<4x8x128xf32, #tpu.memory_space<vmem>>, vector<4x8x128xf32>,
    %c0_24 = arith.constant 0 : index
    %c0_25 = arith.constant 0 : index
    %c0_26 = arith.constant 0 : index
    %17 = vector.load %arg9[%c0_24, %c0_25, %c0_26] : memref<4x8x128xf32, #tpu.memory_space<vmem>>, vector<4x8x128xf32>
    %18 = arith.addf %4, %8 : vector<4x8x128xf32>
    %19 = arith.addf %17, %18 : vector<4x8x128xf32>
    %c0_27 = arith.constant 0 : index
    %c0_28 = arith.constant 0 : index
    %c0_29 = arith.constant 0 : index
    %20 = vector.load %arg9[%c0_27, %c0_28, %c0_29] : memref<4x8x128xf32, #tpu.memory_space<vmem>>, vector<4x8x128xf32>
    tpu.vector_store %arg9[%c0_27, %c0_28, %c0_29], %19 {strides = array<i32>} : memref<4x8x128xf32, #tpu.memory_space<vmem>>, vector<4x8x128xf32>,
    %c0_30 = arith.constant 0 : index
    %c0_31 = arith.constant 0 : index
    %c0_32 = arith.constant 0 : index
    %21 = vector.load %arg11[%c0_30, %c0_31, %c0_32] : memref<4x8x128xf32, #tpu.memory_space<vmem>>, vector<4x8x128xf32>
    %22 = arith.addf %6, %8 : vector<4x8x128xf32>
    %23 = arith.addf %21, %22 : vector<4x8x128xf32>
    %c0_33 = arith.constant 0 : index
    %c0_34 = arith.constant 0 : index
    %c0_35 = arith.constant 0 : index
    %24 = vector.load %arg11[%c0_33, %c0_34, %c0_35] : memref<4x8x128xf32, #tpu.memory_space<vmem>>, vector<4x8x128xf32>
    tpu.vector_store %arg11[%c0_33, %c0_34, %c0_35], %23 {strides = array<i32>} : memref<4x8x128xf32, #tpu.memory_space<vmem>>, vector<4x8x128xf32>,
    %25 = vector.extract_strided_slice %9 {offsets = [0, 0, 0], sizes = [1, 8, 128], strides = [1, 1, 1]} : vector<4x8x128xf32> to vector<1x8x128xf32>
    %26 = vector.shape_cast %25 : vector<1x8x128xf32> to vector<8x128xf32>
    %27 = vector.extract_strided_slice %9 {offsets = [1, 0, 0], sizes = [1, 8, 128], strides = [1, 1, 1]} : vector<4x8x128xf32> to vector<1x8x128xf32>
    %28 = vector.shape_cast %27 : vector<1x8x128xf32> to vector<8x128xf32>
    %29 = arith.addf %26, %28 : vector<8x128xf32>
    %30 = vector.extract_strided_slice %9 {offsets = [2, 0, 0], sizes = [1, 8, 128], strides = [1, 1, 1]} : vector<4x8x128xf32> to vector<1x8x128xf32>
    %31 = vector.shape_cast %30 : vector<1x8x128xf32> to vector<8x128xf32>
    %32 = arith.addf %29, %31 : vector<8x128xf32>
    %33 = vector.extract_strided_slice %9 {offsets = [3, 0, 0], sizes = [1, 8, 128], strides = [1, 1, 1]} : vector<4x8x128xf32> to vector<1x8x128xf32>
    %34 = vector.shape_cast %33 : vector<1x8x128xf32> to vector<8x128xf32>
    %35 = arith.addf %32, %34 : vector<8x128xf32>
    %36 = vector.extract_strided_slice %10 {offsets = [0, 0, 0], sizes = [1, 8, 128], strides = [1, 1, 1]} : vector<4x8x128xf32> to vector<1x8x128xf32>
    %37 = vector.shape_cast %36 : vector<1x8x128xf32> to vector<8x128xf32>
    %38 = vector.extract_strided_slice %10 {offsets = [1, 0, 0], sizes = [1, 8, 128], strides = [1, 1, 1]} : vector<4x8x128xf32> to vector<1x8x128xf32>
    %39 = vector.shape_cast %38 : vector<1x8x128xf32> to vector<8x128xf32>
    %40 = arith.addf %37, %39 : vector<8x128xf32>
    %41 = vector.extract_strided_slice %10 {offsets = [2, 0, 0], sizes = [1, 8, 128], strides = [1, 1, 1]} : vector<4x8x128xf32> to vector<1x8x128xf32>
    %42 = vector.shape_cast %41 : vector<1x8x128xf32> to vector<8x128xf32>
    %43 = arith.addf %40, %42 : vector<8x128xf32>
    %44 = vector.extract_strided_slice %10 {offsets = [3, 0, 0], sizes = [1, 8, 128], strides = [1, 1, 1]} : vector<4x8x128xf32> to vector<1x8x128xf32>
    %45 = vector.shape_cast %44 : vector<1x8x128xf32> to vector<8x128xf32>
    %46 = arith.addf %43, %45 : vector<8x128xf32>
    %47 = vector.extract_strided_slice %4 {offsets = [0, 0, 0], sizes = [1, 8, 128], strides = [1, 1, 1]} : vector<4x8x128xf32> to vector<1x8x128xf32>
    %48 = vector.shape_cast %47 : vector<1x8x128xf32> to vector<8x128xf32>
    %49 = vector.extract_strided_slice %4 {offsets = [1, 0, 0], sizes = [1, 8, 128], strides = [1, 1, 1]} : vector<4x8x128xf32> to vector<1x8x128xf32>
    %50 = vector.shape_cast %49 : vector<1x8x128xf32> to vector<8x128xf32>
    %51 = arith.maximumf %48, %50 : vector<8x128xf32>
    %52 = vector.extract_strided_slice %4 {offsets = [2, 0, 0], sizes = [1, 8, 128], strides = [1, 1, 1]} : vector<4x8x128xf32> to vector<1x8x128xf32>
    %53 = vector.shape_cast %52 : vector<1x8x128xf32> to vector<8x128xf32>
    %54 = arith.maximumf %51, %53 : vector<8x128xf32>
    %55 = vector.extract_strided_slice %4 {offsets = [3, 0, 0], sizes = [1, 8, 128], strides = [1, 1, 1]} : vector<4x8x128xf32> to vector<1x8x128xf32>
    %56 = vector.shape_cast %55 : vector<1x8x128xf32> to vector<8x128xf32>
    %57 = arith.maximumf %54, %56 : vector<8x128xf32>
    %58 = vector.shape_cast %57 : vector<8x128xf32> to vector<1x8x128xf32>
    %59 = vector.broadcast %58 : vector<1x8x128xf32> to vector<4x8x128xf32>
    %60 = arith.subf %4, %59 : vector<4x8x128xf32>
    %61 = math.exp %60 : vector<4x8x128xf32>
    %62 = vector.extract_strided_slice %61 {offsets = [0, 0, 0], sizes = [1, 8, 128], strides = [1, 1, 1]} : vector<4x8x128xf32> to vector<1x8x128xf32>
    %63 = vector.shape_cast %62 : vector<1x8x128xf32> to vector<8x128xf32>
    %64 = vector.extract_strided_slice %61 {offsets = [1, 0, 0], sizes = [1, 8, 128], strides = [1, 1, 1]} : vector<4x8x128xf32> to vector<1x8x128xf32>
    %65 = vector.shape_cast %64 : vector<1x8x128xf32> to vector<8x128xf32>
    %66 = arith.addf %63, %65 : vector<8x128xf32>
    %67 = vector.extract_strided_slice %61 {offsets = [2, 0, 0], sizes = [1, 8, 128], strides = [1, 1, 1]} : vector<4x8x128xf32> to vector<1x8x128xf32>
    %68 = vector.shape_cast %67 : vector<1x8x128xf32> to vector<8x128xf32>
    %69 = arith.addf %66, %68 : vector<8x128xf32>
    %70 = vector.extract_strided_slice %61 {offsets = [3, 0, 0], sizes = [1, 8, 128], strides = [1, 1, 1]} : vector<4x8x128xf32> to vector<1x8x128xf32>
    %71 = vector.shape_cast %70 : vector<1x8x128xf32> to vector<8x128xf32>
    %72 = arith.addf %69, %71 : vector<8x128xf32>
    %73 = math.log %72 : vector<8x128xf32>
    %74 = arith.addf %73, %57 : vector<8x128xf32>
    %75 = arith.subf %74, %35 : vector<8x128xf32>
    %76 = vector.extract_strided_slice %6 {offsets = [0, 0, 0], sizes = [1, 8, 128], strides = [1, 1, 1]} : vector<4x8x128xf32> to vector<1x8x128xf32>
    %77 = vector.shape_cast %76 : vector<1x8x128xf32> to vector<8x128xf32>
    %78 = vector.extract_strided_slice %6 {offsets = [1, 0, 0], sizes = [1, 8, 128], strides = [1, 1, 1]} : vector<4x8x128xf32> to vector<1x8x128xf32>
    %79 = vector.shape_cast %78 : vector<1x8x128xf32> to vector<8x128xf32>
    %80 = arith.maximumf %77, %79 : vector<8x128xf32>
    %81 = vector.extract_strided_slice %6 {offsets = [2, 0, 0], sizes = [1, 8, 128], strides = [1, 1, 1]} : vector<4x8x128xf32> to vector<1x8x128xf32>
    %82 = vector.shape_cast %81 : vector<1x8x128xf32> to vector<8x128xf32>
    %83 = arith.maximumf %80, %82 : vector<8x128xf32>
    %84 = vector.extract_strided_slice %6 {offsets = [3, 0, 0], sizes = [1, 8, 128], strides = [1, 1, 1]} : vector<4x8x128xf32> to vector<1x8x128xf32>
    %85 = vector.shape_cast %84 : vector<1x8x128xf32> to vector<8x128xf32>
    %86 = arith.maximumf %83, %85 : vector<8x128xf32>
    %87 = vector.shape_cast %86 : vector<8x128xf32> to vector<1x8x128xf32>
    %88 = vector.broadcast %87 : vector<1x8x128xf32> to vector<4x8x128xf32>
    %89 = arith.subf %6, %88 : vector<4x8x128xf32>
    %90 = math.exp %89 : vector<4x8x128xf32>
    %91 = vector.extract_strided_slice %90 {offsets = [0, 0, 0], sizes = [1, 8, 128], strides = [1, 1, 1]} : vector<4x8x128xf32> to vector<1x8x128xf32>
    %92 = vector.shape_cast %91 : vector<1x8x128xf32> to vector<8x128xf32>
    %93 = vector.extract_strided_slice %90 {offsets = [1, 0, 0], sizes = [1, 8, 128], strides = [1, 1, 1]} : vector<4x8x128xf32> to vector<1x8x128xf32>
    %94 = vector.shape_cast %93 : vector<1x8x128xf32> to vector<8x128xf32>
    %95 = arith.addf %92, %94 : vector<8x128xf32>
    %96 = vector.extract_strided_slice %90 {offsets = [2, 0, 0], sizes = [1, 8, 128], strides = [1, 1, 1]} : vector<4x8x128xf32> to vector<1x8x128xf32>
    %97 = vector.shape_cast %96 : vector<1x8x128xf32> to vector<8x128xf32>
    %98 = arith.addf %95, %97 : vector<8x128xf32>
    %99 = vector.extract_strided_slice %90 {offsets = [3, 0, 0], sizes = [1, 8, 128], strides = [1, 1, 1]} : vector<4x8x128xf32> to vector<1x8x128xf32>
    %100 = vector.shape_cast %99 : vector<1x8x128xf32> to vector<8x128xf32>
    %101 = arith.addf %98, %100 : vector<8x128xf32>
    %102 = math.log %101 : vector<8x128xf32>
    %103 = arith.addf %102, %86 : vector<8x128xf32>
    %104 = arith.subf %103, %46 : vector<8x128xf32>
    %c1_i32 = arith.constant 1 : i32
    %105 = arith.muli %arg1, %c1_i32 : i32
    %106 = arith.addi %105, %arg2 : i32
    %c1024_i32 = arith.constant 1024 : i32
    %107 = arith.muli %106, %c1024_i32 : i32
    %108 = tpu.iota {dimensions = array<i32: 0>} : vector<8x128xi32>
    %c128_i32 = arith.constant 128 : i32
    %109 = vector.broadcast %c128_i32 : i32 to vector<8x128xi32>
    %110 = arith.muli %108, %109 : vector<8x128xi32>
    %111 = vector.broadcast %107 : i32 to vector<8x128xi32>
    %112 = arith.addi %111, %110 : vector<8x128xi32>
    %113 = tpu.iota {dimensions = array<i32: 1>} : vector<8x128xi32>
    %114 = arith.addi %112, %113 : vector<8x128xi32>
    %c256_i32 = arith.constant 256 : i32
    %115 = vector.broadcast %c256_i32 : i32 to vector<8x128xi32>
    %116 = arith.cmpi slt, %114, %115 : vector<8x128xi32>
    %cst = arith.constant 0.000000e+00 : f32
    %117 = vector.broadcast %cst : f32 to vector<8x128xf32>
    %118 = arith.select %116, %75, %117 : vector<8x128xi1>, vector<8x128xf32>
    %cst_36 = arith.constant 0.000000e+00 : f32
    %119 = vector.broadcast %cst_36 : f32 to vector<8x128xf32>
    %120 = arith.select %116, %104, %119 : vector<8x128xi1>, vector<8x128xf32>
    %c0_37 = arith.constant 0 : index
    %c0_38 = arith.constant 0 : index
    %121 = vector.load %arg12[%c0_37, %c0_38] : memref<8x128xf32, #tpu.memory_space<vmem>>, vector<8x128xf32>
    %122 = arith.addf %121, %118 : vector<8x128xf32>
    %c0_39 = arith.constant 0 : index
    %c0_40 = arith.constant 0 : index
    %123 = vector.load %arg12[%c0_39, %c0_40] : memref<8x128xf32, #tpu.memory_space<vmem>>, vector<8x128xf32>
    tpu.vector_store %arg12[%c0_39, %c0_40], %122 {strides = array<i32>} : memref<8x128xf32, #tpu.memory_space<vmem>>, vector<8x128xf32>,
    %c0_41 = arith.constant 0 : index
    %c0_42 = arith.constant 0 : index
    %124 = vector.load %arg13[%c0_41, %c0_42] : memref<8x128xf32, #tpu.memory_space<vmem>>, vector<8x128xf32>
    %125 = arith.addf %124, %120 : vector<8x128xf32>
    %c0_43 = arith.constant 0 : index
    %c0_44 = arith.constant 0 : index
    %126 = vector.load %arg13[%c0_43, %c0_44] : memref<8x128xf32, #tpu.memory_space<vmem>>, vector<8x128xf32>
    tpu.vector_store %arg13[%c0_43, %c0_44], %125 {strides = array<i32>} : memref<8x128xf32, #tpu.memory_space<vmem>>, vector<8x128xf32>,
    %c0_i32_45 = arith.constant 0 : i32
    %127 = arith.cmpi eq, %arg2, %c0_i32_45 : i32
    %128 = arith.extui %127 : i1 to i32
    %c0_i32_46 = arith.constant 0 : i32
    %129 = arith.cmpi ne, %128, %c0_i32_46 : i32
    scf.if %129 {
      %c0_47 = arith.constant 0 : index
      %c0_48 = arith.constant 0 : index
      %c0_49 = arith.constant 0 : index
      %130 = vector.load %arg8[%c0_47, %c0_48, %c0_49] : memref<4x8x128xf32, #tpu.memory_space<vmem>>, vector<4x8x128xf32>
      %cst_50 = arith.constant dense<0.000000e+00> : vector<4x8xf32>
      %131 = vector.multi_reduction <add>, %130, %cst_50 [2] : vector<4x8x128xf32> to vector<4x8xf32>
      %cst_51 = arith.constant dense<0.000000e+00> : vector<4xf32>
      %132 = vector.multi_reduction <add>, %131, %cst_51 [1] : vector<4x8xf32> to vector<4xf32>
      %133 = vector.shape_cast %132 : vector<4xf32> to vector<4x1xf32>
      %c0_52 = arith.constant 0 : index
      %c0_53 = arith.constant 0 : index
      %c0_54 = arith.constant 0 : index
      %134 = vector.load %arg9[%c0_52, %c0_53, %c0_54] : memref<4x8x128xf32, #tpu.memory_space<vmem>>, vector<4x8x128xf32>
      %cst_55 = arith.constant dense<0.000000e+00> : vector<4x8xf32>
      %135 = vector.multi_reduction <add>, %134, %cst_55 [2] : vector<4x8x128xf32> to vector<4x8xf32>
      %cst_56 = arith.constant dense<0.000000e+00> : vector<4xf32>
      %136 = vector.multi_reduction <add>, %135, %cst_56 [1] : vector<4x8xf32> to vector<4xf32>
      %137 = vector.shape_cast %136 : vector<4xf32> to vector<4x1xf32>
      %c0_57 = arith.constant 0 : index
      %c0_58 = arith.constant 0 : index
      %c0_59 = arith.constant 0 : index
      %138 = vector.load %arg10[%c0_57, %c0_58, %c0_59] : memref<4x8x128xf32, #tpu.memory_space<vmem>>, vector<4x8x128xf32>
      %cst_60 = arith.constant dense<0.000000e+00> : vector<4x8xf32>
      %139 = vector.multi_reduction <add>, %138, %cst_60 [2] : vector<4x8x128xf32> to vector<4x8xf32>
      %cst_61 = arith.constant dense<0.000000e+00> : vector<4xf32>
      %140 = vector.multi_reduction <add>, %139, %cst_61 [1] : vector<4x8xf32> to vector<4xf32>
      %141 = vector.shape_cast %140 : vector<4xf32> to vector<4x1xf32>
      %c0_62 = arith.constant 0 : index
      %c0_63 = arith.constant 0 : index
      %c0_64 = arith.constant 0 : index
      %142 = vector.load %arg11[%c0_62, %c0_63, %c0_64] : memref<4x8x128xf32, #tpu.memory_space<vmem>>, vector<4x8x128xf32>
      %cst_65 = arith.constant dense<0.000000e+00> : vector<4x8xf32>
      %143 = vector.multi_reduction <add>, %142, %cst_65 [2] : vector<4x8x128xf32> to vector<4x8xf32>
      %cst_66 = arith.constant dense<0.000000e+00> : vector<4xf32>
      %144 = vector.multi_reduction <add>, %143, %cst_66 [1] : vector<4x8xf32> to vector<4xf32>
      %145 = vector.shape_cast %144 : vector<4xf32> to vector<4x1xf32>
      %146 = tpu.iota {dimensions = array<i32: 3>} : vector<1x1x4x128xi32>
      %c0_i32_67 = arith.constant 0 : i32
      %147 = vector.broadcast %c0_i32_67 : i32 to vector<1x1x4x128xi32>
      %148 = arith.cmpi eq, %146, %147 : vector<1x1x4x128xi32>
      %cst_68 = arith.constant 0.000000e+00 : f32
      %149 = vector.shape_cast %133 : vector<4x1xf32> to vector<1x1x4x1xf32>
      %150 = vector.broadcast %149 : vector<1x1x4x1xf32> to vector<1x1x4x128xf32>
      %151 = vector.broadcast %cst_68 : f32 to vector<1x1x4x128xf32>
      %152 = arith.select %148, %150, %151 : vector<1x1x4x128xi1>, vector<1x1x4x128xf32>
      %c1_i32_69 = arith.constant 1 : i32
      %153 = vector.broadcast %c1_i32_69 : i32 to vector<1x1x4x128xi32>
      %154 = arith.cmpi eq, %146, %153 : vector<1x1x4x128xi32>
      %cst_70 = arith.constant 0.000000e+00 : f32
      %155 = vector.shape_cast %137 : vector<4x1xf32> to vector<1x1x4x1xf32>
      %156 = vector.broadcast %155 : vector<1x1x4x1xf32> to vector<1x1x4x128xf32>
      %157 = vector.broadcast %cst_70 : f32 to vector<1x1x4x128xf32>
      %158 = arith.select %154, %156, %157 : vector<1x1x4x128xi1>, vector<1x1x4x128xf32>
      %159 = arith.addf %152, %158 : vector<1x1x4x128xf32>
      %c2_i32 = arith.constant 2 : i32
      %160 = vector.broadcast %c2_i32 : i32 to vector<1x1x4x128xi32>
      %161 = arith.cmpi eq, %146, %160 : vector<1x1x4x128xi32>
      %cst_71 = arith.constant 0.000000e+00 : f32
      %162 = vector.shape_cast %141 : vector<4x1xf32> to vector<1x1x4x1xf32>
      %163 = vector.broadcast %162 : vector<1x1x4x1xf32> to vector<1x1x4x128xf32>
      %164 = vector.broadcast %cst_71 : f32 to vector<1x1x4x128xf32>
      %165 = arith.select %161, %163, %164 : vector<1x1x4x128xi1>, vector<1x1x4x128xf32>
      %166 = arith.addf %159, %165 : vector<1x1x4x128xf32>
      %c3_i32 = arith.constant 3 : i32
      %167 = vector.broadcast %c3_i32 : i32 to vector<1x1x4x128xi32>
      %168 = arith.cmpi eq, %146, %167 : vector<1x1x4x128xi32>
      %cst_72 = arith.constant 0.000000e+00 : f32
      %169 = vector.shape_cast %145 : vector<4x1xf32> to vector<1x1x4x1xf32>
      %170 = vector.broadcast %169 : vector<1x1x4x1xf32> to vector<1x1x4x128xf32>
      %171 = vector.broadcast %cst_72 : f32 to vector<1x1x4x128xf32>
      %172 = arith.select %168, %170, %171 : vector<1x1x4x128xi1>, vector<1x1x4x128xf32>
      %173 = arith.addf %166, %172 : vector<1x1x4x128xf32>
      %c0_73 = arith.constant 0 : index
      %c0_74 = arith.constant 0 : index
      %c0_75 = arith.constant 0 : index
      %c0_76 = arith.constant 0 : index
      %174 = vector.load %arg7[%c0_73, %c0_74, %c0_75, %c0_76] : memref<1x1x4x128xf32, #tpu.memory_space<vmem>>, vector<1x1x4x128xf32>
      tpu.vector_store %arg7[%c0_73, %c0_74, %c0_75, %c0_76], %173 {strides = array<i32>} : memref<1x1x4x128xf32, #tpu.memory_space<vmem>>, vector<1x1x4x128xf32>,
      %c0_77 = arith.constant 0 : index
      %c0_78 = arith.constant 0 : index
      %175 = vector.load %arg12[%c0_77, %c0_78] : memref<8x128xf32, #tpu.memory_space<vmem>>, vector<8x128xf32>
      %176 = vector.shape_cast %175 : vector<8x128xf32> to vector<1x8x128xf32>
      %cst_79 = arith.constant dense<0.000000e+00> : vector<1xf32>
      %177 = vector.multi_reduction <add>, %176, %cst_79 [1, 2] : vector<1x8x128xf32> to vector<1xf32>
      %178 = vector.shape_cast %177 : vector<1xf32> to vector<1x1x1xf32>
      %179 = vector.extract %178[0, 0, 0] : f32 from vector<1x1x1xf32>
      %180 = vector.broadcast %179 : f32 to vector<1x1xf32>
      %c0_80 = arith.constant 0 : index
      %c0_81 = arith.constant 0 : index
      %181 = vector.load %arg13[%c0_80, %c0_81] : memref<8x128xf32, #tpu.memory_space<vmem>>, vector<8x128xf32>
      %182 = vector.shape_cast %181 : vector<8x128xf32> to vector<1x8x128xf32>
      %cst_82 = arith.constant dense<0.000000e+00> : vector<1xf32>
      %183 = vector.multi_reduction <add>, %182, %cst_82 [1, 2] : vector<1x8x128xf32> to vector<1xf32>
      %184 = vector.shape_cast %183 : vector<1xf32> to vector<1x1x1xf32>
      %185 = vector.extract %184[0, 0, 0] : f32 from vector<1x1x1xf32>
      %186 = vector.broadcast %185 : f32 to vector<1x1xf32>
      %187 = tpu.iota {dimensions = array<i32: 3>} : vector<1x1x8x128xi32>
      %c0_i32_83 = arith.constant 0 : i32
      %188 = vector.broadcast %c0_i32_83 : i32 to vector<1x1x8x128xi32>
      %189 = arith.cmpi eq, %187, %188 : vector<1x1x8x128xi32>
      %cst_84 = arith.constant 0.000000e+00 : f32
      %190 = vector.shape_cast %180 : vector<1x1xf32> to vector<1x1x1x1xf32>
      %191 = vector.broadcast %190 : vector<1x1x1x1xf32> to vector<1x1x8x128xf32>
      %192 = vector.broadcast %cst_84 : f32 to vector<1x1x8x128xf32>
      %193 = arith.select %189, %191, %192 : vector<1x1x8x128xi1>, vector<1x1x8x128xf32>
      %c1_i32_85 = arith.constant 1 : i32
      %194 = vector.broadcast %c1_i32_85 : i32 to vector<1x1x8x128xi32>
      %195 = arith.cmpi eq, %187, %194 : vector<1x1x8x128xi32>
      %cst_86 = arith.constant 0.000000e+00 : f32
      %196 = vector.shape_cast %186 : vector<1x1xf32> to vector<1x1x1x1xf32>
      %197 = vector.broadcast %196 : vector<1x1x1x1xf32> to vector<1x1x8x128xf32>
      %198 = vector.broadcast %cst_86 : f32 to vector<1x1x8x128xf32>
      %199 = arith.select %195, %197, %198 : vector<1x1x8x128xi1>, vector<1x1x8x128xf32>
      %200 = arith.addf %193, %199 : vector<1x1x8x128xf32>
      %c0_87 = arith.constant 0 : index
      %c0_88 = arith.constant 0 : index
      %c0_89 = arith.constant 0 : index
      %c0_90 = arith.constant 0 : index
      %201 = vector.load %arg6[%c0_87, %c0_88, %c0_89, %c0_90] : memref<1x1x8x128xf32, #tpu.memory_space<vmem>>, vector<1x1x8x128xf32>
      tpu.vector_store %arg6[%c0_87, %c0_88, %c0_89, %c0_90], %200 {strides = array<i32>} : memref<1x1x8x128xf32, #tpu.memory_space<vmem>>, vector<1x1x8x128xf32>,
    } else {
    }
    return
  }
  func.func @transform_0(%arg0: i32, %arg1: i32, %arg2: i32) -> (i32, i32, i32, i32) {
    %c1_i32 = arith.constant 1 : i32
    %0 = arith.muli %arg1, %c1_i32 : i32
    %1 = arith.addi %0, %arg2 : i32
    %c0_i32 = arith.constant 0 : i32
    %c0_i32_0 = arith.constant 0 : i32
    %c0_i32_1 = arith.constant 0 : i32
    return %arg0, %c0_i32, %1, %c0_i32_0 : i32, i32, i32, i32
  }
  func.func @transform_1(%arg0: i32, %arg1: i32, %arg2: i32) -> (i32, i32, i32, i32) {
    %c1_i32 = arith.constant 1 : i32
    %0 = arith.muli %arg1, %c1_i32 : i32
    %1 = arith.addi %0, %arg2 : i32
    %c0_i32 = arith.constant 0 : i32
    %c0_i32_0 = arith.constant 0 : i32
    %c0_i32_1 = arith.constant 0 : i32
    return %arg0, %c0_i32, %1, %c0_i32_0 : i32, i32, i32, i32
  }
  func.func @transform_2(%arg0: i32, %arg1: i32, %arg2: i32) -> (i32, i32, i32, i32) {
    %c1_i32 = arith.constant 1 : i32
    %0 = arith.muli %arg1, %c1_i32 : i32
    %1 = arith.addi %0, %arg2 : i32
    %c0_i32 = arith.constant 0 : i32
    %c0_i32_0 = arith.constant 0 : i32
    %c0_i32_1 = arith.constant 0 : i32
    return %arg0, %c0_i32, %1, %c0_i32_0 : i32, i32, i32, i32
  }
  func.func @transform_3(%arg0: i32, %arg1: i32, %arg2: i32) -> (i32, i32, i32, i32) {
    %c0_i32 = arith.constant 0 : i32
    %c0_i32_0 = arith.constant 0 : i32
    %c0_i32_1 = arith.constant 0 : i32
    return %arg0, %arg1, %c0_i32, %c0_i32_0 : i32, i32, i32, i32
  }
  func.func @transform_4(%arg0: i32, %arg1: i32, %arg2: i32) -> (i32, i32, i32, i32) {
    %c0_i32 = arith.constant 0 : i32
    %c0_i32_0 = arith.constant 0 : i32
    %c0_i32_1 = arith.constant 0 : i32
    return %arg0, %arg1, %c0_i32, %c0_i32_0 : i32, i32, i32, i32
  }
}

</mosaic_0001>

<bundles_post_ra>
// kernel: tpu_custom_call.1
= control target key start
LH: loop header
LB: loop body
LE: loop exit
PB: predicated region body
PF: predicated region fallthrough
CT: control target
= control target key end

     0   :  { %s1576_s0 = inlined_call_operand.hbm [shape: f32[2,4,8,128], index: 0, kind: input, shape index: {}]   ;;  %s1577_s1 = inlined_call_operand.hbm [shape: f32[2,4,8,128], index: 1, kind: input, shape index: {}]   ;;  %s1578_s2 = inlined_call_operand.hbm [shape: f32[2,4,8,128], index: 2, kind: input, shape index: {}]   ;;  %s1579_s3 = inlined_call_operand.hbm [shape: f32[2,1,8,128], index: 3, kind: output, shape index: {0}]   ;;  %s1580_s4 = inlined_call_operand.hbm [shape: f32[2,1,4,128], index: 4, kind: output, shape index: {1}]  }
   0x1   :  { %1587 = sst [smem:[#allocation25_spill]] %s1577_s1 }
   0x2   :  { %10 = vsyncpa [#allocation9], 0 }
   0x3   :  { %12 = vsyncpa [#allocation9 + $0x1], 0 }
   0x4   :  { %13 = vsyncpa [#allocation12], 0 }
   0x5   :  { %15 = vsyncpa [#allocation12 + $0x1], 0 }
   0x6   :  { %16 = vsyncpa [#allocation10], 0 }
   0x7   :  { %18 = vsyncpa [#allocation10 + $0x1], 0 }
   0x8   :  { %19 = vsyncpa [#allocation16], 0 }
   0x9   :  { %21 = vsyncpa [#allocation16 + $0x1], 0  ;;  %s1280_s15 = smov 0   ;;  %s1282_s16 = smov 0  }
   0xa   :  { %s1284_s17 = smov 0   ;;  %s1286_s18 = smov 0  }
   0xb   :  { %s1288_s19 = smov 0   ;;  %s1290_s20 = smov 0  }
   0xc LB: > { %1588 = sst [smem:[#allocation21_spill]] %s1242_s19  ;;  %s1311_s21 = sadd.s32 4294967295, %s1246_s20   ;;  %s1246_s20 = sphi %s1290_s20, %s27_s20   ;;  %s1242_s19 = sphi %s1288_s19, %s1605_s19   ;;  %s1238_s18 = sphi %s1286_s18, %s1604_s18   ;;  %s1234_s17 = sphi %s1284_s17, %s1608_s17   ;;  %s1230_s16 = sphi %s1282_s16, %s1607_s16   ;;  %s1226_s15 = sphi %s1280_s15, %s1606_s15  }
   0xd   : > { %s918_s22 = sadd.s32 4294967294, %s1246_s20   ;;  %s46_s23 = sadd.s32 1, %s1242_s19 }
   0xe   : > { %s57_s24 = sadd.s32 1, %s1234_s17  ;;  %p48_p0 = scmp.ge.s32.totalorder %s46_s23, 2 }
   0xf   : > { %p64_p1 = scmp.ne.s32.totalorder %s1234_s17, %s1230_s16  ;;  %p65_p2 = scmp.eq.s32.totalorder %s1246_s20, 0 }
  0x10   : > { %p70_p3 = scmp.ne.s32.totalorder %s1230_s16, %s1226_s15  ;;  %s1610_s23 = smov (%p48_p0, %s46_s23), 0 }
  0x11   : > { %1589 = sst [smem:[#allocation22_spill]] %s1610_s23  ;;  %p1323_p4 = por %p65_p2, %p64_p1 }
  0x12   : > { %p71_p5 = scmp.eq.s32.totalorder %s1311_s21, 0  ;;  %s52_s26 = ssub.s32 %s1242_s19, %s1610_s23 }
  0x13   : > { %p156_p6 = scmp.eq.s32.totalorder %s1311_s21, 1  ;;  %p55_p7 = scmp.eq.s32.totalorder %s52_s26, 0 }
  0x14   : > { %p1331_p8 = por %p71_p5, %p70_p3  ;;  %p162_p10 = scmp.eq.s32.totalorder %s918_s22, 1 }
  0x15   : > { %p1335_p9 = por %p156_p6, %p64_p1  ;;  %p976_p13 = scmp.lt.s32.totalorder %s1246_s20, 2 }
  0x16   : > { %s1340_s29 = scalar_select %p55_p7, %s1234_s17, %s57_s24  }
  0x17   : > { %p1342_p11 = por %p162_p10, %p70_p3  ;;  %s1581_s5 = sand.u32 1, %s1234_s17  }
  0x18   : > { %1593 = sst [smem:[#allocation23_spill]] %s1340_s29  ;;  %s1351_s6 = sshll.u32 %s1581_s5, 5 }
  0x19   : > { %s1594_s30 = scalar_select %p1342_p11, 1, 0 }
  0x1a   : > { %s1354_s7 = sshll.u32 %s1242_s19, 9  ;;  %p1358_p0 = pnand %p976_p13, %p1323_p4 }
  0x1b   : > { %1595 = sst [smem:[#allocation24_spill]] %s1594_s30  ;;  %s233_s9 = sand.u32 1, %s1246_s20  }
  0x1c   : > { %s1597_s1 = sld [smem:[#allocation25_spill]]  ;;  %s237_s13 = scalar_lea.vmem [#allocation11], %s1351_s6 }
  0x1d   : > { %s246_s14 = sshll.u32 %s237_s13, 4  ;;  %p930_p1 = scmp.ge.s32.totalorder %s1246_s20, 1  ;;  %s247_s14 = int_to_ptr.vmem [resolvable:$true] %s246_s14 }
  0x1e   : > { %p277_p2 = scmp.lt.s32.totalorder %s1246_s20, 3  ;;  %s1370_s22 = scalar_lea.sflag [#allocation12], %s233_s9 }
  0x1f   : > { %p1050_p3 = pneg %p1358_p0  ;;  %s1061_s24 = scalar_lea.vmem %s247_s14, 512 }
  0x20   : > { %p1062_p4 = scmp.ne.s32.totalorder %s247_s14, %s1061_s24  ;;  %s1248_s25 = smov [#allocation11]  }
  0x21   : > { %s1066_s26 = sshll.u32 %s1248_s25, 4  ;;  %s1067_s26 = int_to_ptr.vmem [resolvable:$false] %s1066_s26 }
  0x22   : > { %s245_s12 = scalar_lea.hbm %s1597_s1, %s1354_s7  ;;  %p1064_p5 = pnand %p1062_p4, %p1050_p3 }
  0x23   : > { %s1068_s10 = scalar_lea.vmem %s1067_s26, 1024  ;;  %p1069_p7 = scmp.lt.s32.totalorder %s247_s14, %s1067_s26 }
  0x24   : > { %p1065_p6 = pneg %p1064_p5  ;;  %p1070_p10 = scmp.lt.s32.totalorder %s1068_s10, %s1061_s24 }
  0x26   : > { %p1071_p13 = por %p1070_p10, %p1069_p7 }
  0x28   : > { %p1072_p12 = pnand %p1071_p13, %p1065_p6 }
  0x2a   : > { %1075 = shalt.err (!%p1072_p12)
}
  0x2b   : > { %s1585_s11 = smov 128   ;;  %s1250_s9 = smov 8  }
  0x2c   : > { %965 = dma.hbm_to_vmem [thread:$0]  (!%p1358_p0), %s245_s12, 512, %s247_s14, %s1370_s22, %s1585_s11, %s1585_s11, %s1250_s9  }
  0x2d   : > { %p1387_p4 = pnand %p930_p1, %p277_p2  ;;  %s222_s26 = scalar_lea.hbm %s1576_s0, %s1354_s7 }
  0x2e   : > { %s214_s10 = scalar_lea.vmem [#allocation8], %s1351_s6  ;;  %s268_s19 = scalar_lea.hbm %s1578_s2, %s1354_s7 }
  0x2f   : > { %s223_s5 = sshll.u32 %s214_s10, 4  ;;  %s1599_s29 = sand.u32 1, %s1234_s17   ;;  %s224_s5 = int_to_ptr.vmem [resolvable:$true] %s223_s5 }
  0x30   : > { %s211_s30 = scalar_lea.sflag [#allocation9], %s1599_s29  ;;  %s1089_s12 = scalar_lea.vmem %s224_s5, 512 }
  0x31   : > { %p1090_p12 = scmp.ne.s32.totalorder %s224_s5, %s1089_s12  ;;  %s1251_s14 = smov [#allocation8]  }
  0x32   : > { %s1094_s11 = sshll.u32 %s1251_s14, 4  ;;  %s1095_s11 = int_to_ptr.vmem [resolvable:$false] %s1094_s11 }
  0x33   : > { %p1092_p1 = pnand %p1090_p12, %p1050_p3  ;;  %s1096_s24 = scalar_lea.vmem %s1095_s11, 1024 }
  0x34   : > { %p1097_p5 = scmp.lt.s32.totalorder %s224_s5, %s1095_s11  ;;  %p1098_p6 = scmp.lt.s32.totalorder %s1096_s24, %s1089_s12 }
  0x35   : > { %p1093_p2 = pneg %p1092_p1 }
  0x36   : > { %p1099_p7 = por %p1098_p6, %p1097_p5 }
  0x38   : > { %p1100_p10 = pnand %p1099_p7, %p1093_p2 }
  0x3a   : > { %1103 = shalt.err (!%p1100_p10)
}
  0x3b   : > { %s1600_s1 = smov 128   ;;  %s260_s23 = scalar_lea.vmem [#allocation13], %s1351_s6 }
  0x3c   : > { %962 = dma.hbm_to_vmem [thread:$0]  (!%p1358_p0), %s222_s26, 512, %s224_s5, %s211_s30, %s1600_s1, %s1600_s1, %s1250_s9  }
  0x3d   : > { %s269_s29 = sshll.u32 %s260_s23, 4  ;;  %s1252_s11 = smov [#allocation13]   ;;  %s270_s29 = int_to_ptr.vmem [resolvable:$true] %s269_s29 }
  0x3e   : > { %s1117_s25 = scalar_lea.vmem %s270_s29, 512  ;;  %s1122_s10 = sshll.u32 %s1252_s11, 4  ;;  %s1123_s10 = int_to_ptr.vmem [resolvable:$false] %s1122_s10 }
  0x3f   : > { %p1118_p13 = scmp.ne.s32.totalorder %s270_s29, %s1117_s25  ;;  %s1124_s12 = scalar_lea.vmem %s1123_s10, 1024 }
  0x40   : > { %p1125_p2 = scmp.lt.s32.totalorder %s270_s29, %s1123_s10  ;;  %p1126_p5 = scmp.lt.s32.totalorder %s1124_s12, %s1117_s25 }
  0x41   : > { %p1120_p12 = pnand %p1118_p13, %p1050_p3 }
  0x42   : > { %p1127_p6 = por %p1126_p5, %p1125_p2 }
  0x43   : > { %p1121_p1 = pneg %p1120_p12 }
  0x45   : > { %p1128_p7 = pnand %p1127_p6, %p1121_p1 }
  0x47   : > { %1131 = shalt.err (!%p1128_p7)
}
  0x48   : > { %968 = dma.hbm_to_vmem [thread:$0]  (!%p1358_p0), %s268_s19, 512, %s270_s29, %s1370_s22, %s1600_s1, %s1600_s1, %s1250_s9  }
  0x49   : > { %281 = sbr.rel (%p1387_p4) target bundleno = 411 (0x19b), region = 32  ;;  %s1428_s6 = sand.u32 (!%p1387_p4), 1, %s1230_s16  }
  0x4a   : > { %s931_s8 = sshll.u32 (!%p1387_p4), %s1428_s6, 5  ;;  %s284_s26 = scalar_lea.sflag (!%p1387_p4), [#allocation9], %s1428_s6 }
  0x4b   : > { %s287_s14 = scalar_lea.vmem (!%p1387_p4), [#allocation8], %s931_s8 }
  0x4e   : > { %1209 = dma.done.wait (%p1331_p8), %s284_s26, 512  }
  0x4f   : > { %1211 = vsyncadd (%p1331_p8), %s284_s26, 4294966784  ;;  %s292_s19 = sand.u32 1, %s1311_s21   ;;  %s1437_s22 = scalar_lea.vmem [#allocation11], %s931_s8 }
  0x50   : > { %s293_s7 = scalar_lea.sflag [#allocation12], %s292_s19 }
  0x51   : > { %1213 = dma.done.wait (%p1331_p8), %s293_s7, 1024  }
  0x52   : > { %1215 = vsyncadd (%p1331_p8), %s293_s7, 4294966272  ;;  %v370_v0 = vld [vmem:[%s287_s14] sm:$0xff]  ;;  %s305_s9 = scalar_lea.vmem [#allocation13], %s931_s8  ;;  %v371_v2 = vld [vmem:[%s287_s14 + $0x8] sm:$0xff]  ;;  %v498_v63 = vlaneseq  ;;  %vm550_vm1 = vcmask 1041409   ;;  %vm552_vm2 = vcmask 1042434  }
  0x53   : > { %v1443_v1 = vld [vmem:[%s305_s9] sm:$0xff]  ;;  %v379_v5 = vld [vmem:[%s305_s9 + $0x8] sm:$0xff]  ;;  %v452_v6 = vmax.f32 %v370_v0, %v371_v2  ;;  %v372_v7 = vld [vmem:[%s287_s14 + $0x10] sm:$0xff]  ;;  %vm554_vm3 = vcmask 1043459   ;;  %vm557_vm4 = vcmask 60416   ;;  %s934_s27 = sshll.u32 %s1428_s6, 3 }
  0x54   : > { %v418_v3 = vadd.f32 %v1443_v1, %v370_v0  ;;  %v1447_v4 = vmul.f32 %v1443_v1, %v370_v0  ;;  %v419_v8 = vadd.f32 %v379_v5, %v371_v2  ;;  %v1450_v9 = vmul.f32 %v379_v5, %v371_v2  ;;  %v1452_v10 = vld [vmem:[%s305_s9 + $0x10] sm:$0xff]  ;;  %v375_v12 = vld [vmem:[%s1437_s22 + $0x8] sm:$0xff]  ;;  %v374_v13 = vld [vmem:[%s1437_s22] sm:$0xff]  ;;  %s938_s13 = sshll.u32 %s1238_s18, 7  ;;  %s337_s1 = scalar_lea.vmem [#allocation14], %s934_s27 }
  0x55   : > { %v453_v11 = vmax.f32 %v452_v6, %v372_v7  ;;  %v373_v14 = vld [vmem:[%s287_s14 + $0x18] sm:$0xff]  ;;  %v474_v15 = vmax.f32 %v374_v13, %v375_v12  ;;  %v376_v17 = vld [vmem:[%s1437_s22 + $0x10] sm:$0xff]  ;;  %v420_v18 = vadd.f32 %v1452_v10, %v372_v7  ;;  %v1461_v19 = vmul.f32 %v1452_v10, %v372_v7  ;;  %s736_s23 = sshll.u32 %s337_s1, 4  ;;  %s734_s11 = scalar_lea.hbm %s1579_s3, %s938_s13  ;;  %s737_s23 = int_to_ptr.vmem [resolvable:$true] %s736_s23 }
  0x56   : > { %565 = vadd.xlane.f32.xlu1 %v418_v3  ;;  %522 = vadd.xlane.f32.xlu0 %v1447_v4  ;;  %v377_v24 = vld [vmem:[%s1437_s22 + $0x18] sm:$0xff]  ;;  %v387_v42 = vmul.f32 %v379_v5, %v375_v12  ;;  %v386_v43 = vmul.f32 %v1443_v1, %v374_v13  ;;  %v388_v45 = vmul.f32 %v1452_v10, %v376_v17  ;;  %s717_s10 = scalar_lea.sflag [#allocation10], %s1428_s6  ;;  %s1132_s12 = scalar_lea.vmem %s737_s23, 128 }
  0x57   : > { %v1456_v16 = vmax.f32 %v453_v11, %v373_v14  ;;  %v475_v20 = vmax.f32 %v474_v15, %v376_v17  ;;  %v381_v25 = vld [vmem:[%s305_s9 + $0x18] sm:$0xff]  ;;  %v435_v46 = vadd.f32 %v379_v5, %v375_v12  ;;  %v434_v47 = vadd.f32 %v1443_v1, %v374_v13  ;;  %p1133_p8 = scmp.ne.s32.totalorder %s737_s23, %s1132_s12  ;;  %s1253_s30 = smov [#allocation14]  }
  0x58   : > { %v421_v35 = vadd.f32 %v381_v25, %v373_v14  ;;  %v385_v36 = vmul.f32 %v381_v25, %v373_v14  ;;  %v389_v44 = vmul.f32 %v381_v25, %v377_v24  ;;  %v436_v53 = vadd.f32 %v1452_v10, %v376_v17  ;;  %s1136_s5 = sshll.u32 %s1253_s30, 4  ;;  %s1137_s5 = int_to_ptr.vmem [resolvable:$false] %s1136_s5 }
  0x59   : > { %v455_v21 = vsub.f32 %v370_v0, %v1456_v16  ;;  %v456_v22 = vsub.f32 %v371_v2, %v1456_v16  ;;  %v457_v23 = vsub.f32 %v372_v7, %v1456_v16  ;;  %v458_v26 = vsub.f32 %v373_v14, %v1456_v16  ;;  %p1134_p0 = pnand %p1133_p8, %p1335_p9  ;;  %s1138_s8 = scalar_lea.vmem %s1137_s5, 256 }
  0x5a   : > { %567 = vadd.xlane.f32.xlu1 %v419_v8  ;;  %524 = vadd.xlane.f32.xlu0 %v1450_v9  ;;  %v1469_v27 = vmax.f32 %v475_v20, %v377_v24  ;;  %v437_v54 = vadd.f32 %v381_v25, %v377_v24  ;;  %v499_v1 = vshrl.u32 %v498_v63, 7  ;;  %v446_v2 = vadd.f32 %v1450_v9, %v1447_v4  ;;  %p1139_p4 = scmp.lt.s32.totalorder %s737_s23, %s1137_s5  ;;  %p1140_p10 = scmp.lt.s32.totalorder %s1138_s8, %s1132_s12 }
  0x5b   : > { %v459_v28 = vmul.f32 1.442695, %v455_v21  ;;  %v461_v29 = vmul.f32 1.442695, %v456_v22  ;;  %v463_v30 = vmul.f32 1.442695, %v457_v23  ;;  %v449_v7 = vadd.f32 %v387_v42, %v386_v43  ;;  %p1135_p3 = pneg %p1134_p0 }
  0x5c   : > { %v465_v31 = vmul.f32 1.442695, %v458_v26  ;;  %v477_v32 = vsub.f32 %v374_v13, %v1469_v27  ;;  %v478_v33 = vsub.f32 %v375_v12, %v1469_v27  ;;  %v479_v34 = vsub.f32 %v376_v17, %v1469_v27  ;;  %p1141_p13 = por %p1140_p10, %p1139_p4 }
  0x5d   : > { %1028 = vpow2.f32 %v459_v28  ;;  %v480_v37 = vsub.f32 %v377_v24, %v1469_v27  ;;  %v500_v3 = vmul.u32 128, %v499_v1  ;;  %v1482_v5 = vand.u32 127, %v498_v63 }
  0x5e   : > { %569 = vadd.xlane.f32.xlu1 %v420_v18  ;;  %526 = vadd.xlane.f32.xlu0 %v1461_v19  ;;  %1030 = vpow2.f32 %v461_v29  ;;  %v481_v38 = vmul.f32 1.442695, %v477_v32  ;;  %v483_v39 = vmul.f32 1.442695, %v478_v33  ;;  %v485_v40 = vmul.f32 1.442695, %v479_v34  ;;  %p1142_p12 = pnand %p1141_p13, %p1135_p3 }
  0x5f   : > { %1032 = vpow2.f32 %v463_v30  ;;  %v487_v41 = vmul.f32 1.442695, %v480_v37  ;;  %v447_v6 = vadd.f32 %v446_v2, %v1461_v19  ;;  %v505_v10 = vadd.s32 %v1482_v5, %v500_v3 }
  0x60   : > { %1034 = vpow2.f32 %v465_v31  ;;  %v450_v12 = vadd.f32 %v449_v7, %v388_v45  ;;  %v536_v26 = vsub.s32 %v1482_v5, %v499_v1  ;;  %vm678_vm5 = vcmp.eq.s32.totalorder %v1482_v5, 0 }
  0x61   : > { %1036 = vpow2.f32 %v481_v38  ;;  %v448_v11 = vadd.f32 %v447_v6, %v385_v36  ;;  %vm506_vm0 = vcmp.lt.s32.totalorder %v505_v10, 256  ;;  %vm680_vm6 = vcmp.eq.s32.totalorder %v1482_v5, 1 }
  0x62   : > { %571 = vadd.xlane.f32.xlu1 %v421_v35  ;;  %528 = vadd.xlane.f32.xlu0 %v385_v36  ;;  %1038 = vpow2.f32 %v483_v39  ;;  %v451_v17 = vadd.f32 %v450_v12, %v389_v44 }
  0x63   : > { %1040 = vpow2.f32 %v485_v40 }
  0x64   : > { %1042 = vpow2.f32 %v487_v41 }
  0x66   : > { %606 = vadd.xlane.f32.xlu1 %v387_v42  ;;  %604 = vadd.xlane.f32.xlu0 %v386_v43 }
  0x6a   : > { %610 = vadd.xlane.f32.xlu1 %v389_v44  ;;  %608 = vadd.xlane.f32.xlu0 %v388_v45  ;;  %v1029_v48 = vpop.eup %1028 }
  0x6b   : > { %v1031_v49 = vpop.eup %1030 }
  0x6c   : > { %v1033_v50 = vpop.eup %1032  ;;  %v467_v51 = vadd.f32 %v1031_v49, %v1029_v48 }
  0x6d   : > { %v1035_v52 = vpop.eup %1034 }
  0x6e   : > { %645 = vadd.xlane.f32.xlu1 %v435_v46  ;;  %643 = vadd.xlane.f32.xlu0 %v434_v47  ;;  %v1037_v55 = vpop.eup %1036  ;;  %v468_v56 = vadd.f32 %v1033_v50, %v467_v51 }
  0x6f   : > { %v1039_v57 = vpop.eup %1038 }
  0x70   : > { %v1041_v58 = vpop.eup %1040  ;;  %v489_v59 = vadd.f32 %v1039_v57, %v1037_v55  ;;  %v469_v60 = vadd.f32 %v1035_v52, %v468_v56 }
  0x71   : > { %v1043_v61 = vpop.eup %1042 }
  0x72   : > { %647 = vadd.xlane.f32.xlu0 %v436_v53  ;;  %649 = vadd.xlane.f32.xlu1 %v437_v54  ;;  %v490_v62 = vadd.f32 %v1041_v58, %v489_v59  ;;  %1044 = vlog2.f32 %v469_v60 }
  0x74   : > { %v491_v0 = vadd.f32 %v1043_v61, %v490_v62 }
  0x76   : > { %1046 = vlog2.f32 %v491_v0 }
  0x7f   : > { %v1045_v8 = vpop.eup %1044 }
  0x80   : > { %v471_v13 = vmul.f32 0.6931472, %v1045_v8 }
  0x82   : > { %v472_v14 = vadd.f32 %v471_v13, %v1456_v16 }
  0x83   : > { %v1047_v15 = vpop.eup %1046 }
  0x84   : > { %v493_v18 = vmul.f32 0.6931472, %v1047_v15  ;;  %v473_v20 = vsub.f32 %v472_v14, %v448_v11 }
  0x86   : > { %v494_v4 = vadd.f32 %v493_v18, %v1469_v27  ;;  %v507_v9 = vsel %vm506_vm0, %v473_v20, 0.0 }
  0x87   : > { %691 = vadd.xlane.f32.xlu0 %v507_v9 }
  0x88   : > { %v495_v21 = vsub.f32 %v494_v4, %v451_v17 }
  0x8a   : > { %v508_v19 = vsel %vm506_vm0, %v495_v21, 0.0 }
  0x8b   : > { %701 = vadd.xlane.f32.xlu1 %v508_v19 }
  0xdf   : > { %v566_v22 = vpop.xlane.xlu1 %565  ;;  %v523_v23 = vpop.xlane.xlu0 %522 }
  0xe0   : > { %v580_v33 = vrot.slane %v566_v22, %v536_v26  ;;  %v537_v27 = vrot.slane %v523_v23, %v536_v26 }
  0xe3   : > { %v568_v24 = vpop.xlane.xlu1 %567  ;;  %v525_v25 = vpop.xlane.xlu0 %524 }
  0xe4   : > { %v584_v29 = vrot.slane %v568_v24, %v536_v26  ;;  %v541_v30 = vrot.slane %v525_v25, %v536_v26 }
  0xe6   : > { %v593_v36 = vsel %vm550_vm1, %v584_v29, %v580_v33  ;;  %v551_v37 = vsel %vm550_vm1, %v541_v30, %v537_v27 }
  0xe7   : > { %v570_v28 = vpop.xlane.xlu1 %569  ;;  %v527_v16 = vpop.xlane.xlu0 %526 }
  0xe8   : > { %v588_v31 = vrot.slane %v570_v28, %v536_v26  ;;  %v545_v32 = vrot.slane %v527_v16, %v536_v26 }
  0xea   : > { %v594_v40 = vsel %vm552_vm2, %v588_v31, %v593_v36  ;;  %v553_v41 = vsel %vm552_vm2, %v545_v32, %v551_v37 }
  0xeb   : > { %v572_v34 = vpop.xlane.xlu1 %571  ;;  %v529_v35 = vpop.xlane.xlu0 %528 }
  0xec   : > { %v592_v38 = vrot.slane %v572_v34, %v536_v26  ;;  %v549_v39 = vrot.slane %v529_v35, %v536_v26 }
  0xee   : > { %v595_v42 = vsel %vm554_vm3, %v592_v38, %v594_v40  ;;  %v555_v43 = vsel %vm554_vm3, %v549_v39, %v553_v41 }
  0xef   : > { %v607_v44 = vpop.xlane.xlu1 %606  ;;  %v605_v45 = vpop.xlane.xlu0 %604  ;;  %v597_v46 = vsel %vm557_vm4, %v595_v42, 0.0  ;;  %v558_v47 = vsel %vm557_vm4, %v555_v43, 0.0 }
  0xf0   : > { %598 = vadd.xlane.f32.xlu1 %v597_v46  ;;  %559 = vadd.xlane.f32.xlu0 %v558_v47  ;;  %v623_v48 = vrot.slane %v607_v44, %v536_v26  ;;  %v619_v49 = vrot.slane %v605_v45, %v536_v26 }
  0xf2   : > { %v632_v54 = vsel %vm550_vm1, %v623_v48, %v619_v49 }
  0xf3   : > { %v611_v50 = vpop.xlane.xlu1 %610  ;;  %v609_v51 = vpop.xlane.xlu0 %608 }
  0xf4   : > { %v631_v52 = vrot.slane %v611_v50, %v536_v26  ;;  %v627_v53 = vrot.slane %v609_v51, %v536_v26 }
  0xf6   : > { %v633_v55 = vsel %vm552_vm2, %v627_v53, %v632_v54 }
  0xf7   : > { %v646_v56 = vpop.xlane.xlu1 %645  ;;  %v644_v57 = vpop.xlane.xlu0 %643  ;;  %v634_v58 = vsel %vm554_vm3, %v631_v52, %v633_v55 }
  0xf8   : > { %v636_v59 = vsel %vm557_vm4, %v634_v58, 0.0  ;;  %v662_v60 = vrot.slane %v646_v56, %v536_v26  ;;  %v658_v61 = vrot.slane %v644_v57, %v536_v26 }
  0xf9   : > { %637 = vadd.xlane.f32.xlu0 %v636_v59 }
  0xfa   : > { %v671_v2 = vsel %vm550_vm1, %v662_v60, %v658_v61 }
  0xfb   : > { %v648_v62 = vpop.xlane.xlu0 %647  ;;  %v650_v63 = vpop.xlane.xlu1 %649 }
  0xfc   : > { %v666_v0 = vrot.slane %v648_v62, %v536_v26  ;;  %v670_v1 = vrot.slane %v650_v63, %v536_v26 }
  0xfe   : > { %v672_v3 = vsel %vm552_vm2, %v666_v0, %v671_v2 }
  0xff   : > { %v673_v6 = vsel %vm554_vm3, %v670_v1, %v672_v3 }
 0x100   : > { %v675_v7 = vsel %vm557_vm4, %v673_v6, 0.0 }
 0x101   : > { %676 = vadd.xlane.f32.xlu1 %v675_v7 }
 0x110   : > { %v692_v8 = vpop.xlane.xlu0 %691 }
 0x111   : > { %v693_v10 = vrot.slane %v692_v8, 4 }
 0x113   : > { %v694_v11 = vadd.f32 %v693_v10, %v692_v8 }
 0x114   : > { %v702_v12 = vpop.xlane.xlu1 %701 }
 0x115   : > { %v703_v13 = vrot.slane %v702_v12, 4  ;;  %v695_v14 = vrot.slane %v694_v11, 2 }
 0x117   : > { %v704_v15 = vadd.f32 %v703_v13, %v702_v12  ;;  %v696_v17 = vadd.f32 %v695_v14, %v694_v11 }
 0x119   : > { %v705_v18 = vrot.slane %v704_v15, 2  ;;  %v697_v20 = vrot.slane %v696_v17, 1 }
 0x11b   : > { %v698_v4 = vadd.f32 %v697_v20, %v696_v17  ;;  %v706_v9 = vadd.f32 %v705_v18, %v704_v15 }
 0x11d   : > { %945 = vpush %v698_v4  ;;  %v707_v21 = vrot.slane %v706_v9, 1 }
 0x11f   : > { %v708_v19 = vadd.f32 %v707_v21, %v706_v9 }
 0x121   : > { %947 = vpush %v708_v19 }
 0x14e   : > { %s946_s21 = spop %945 }
 0x14f   : > { %v710_v22 = vstv %s946_s21 }
 0x150   : > { %v711_v23 = vsel %vm678_vm5, %v710_v22, 0.0 }
 0x152   : > { %s948_s24 = spop %947 }
 0x153   : > { %v712_v24 = vstv %s948_s24 }
 0x154   : > { %v713_v25 = vsel %vm680_vm6, %v712_v24, 0.0 }
 0x155   : > { %v714_v26 = vadd.f32 %v713_v25, %v711_v23 }
 0x157   : > { %715 = vst [vmem:[%s337_s1] sm:$0xff] %v714_v26 }
 0x158   : > { %1145 = shalt.err (!%p1142_p12)
}
 0x159   : > { %s1146_s26 = scalar_lea.hbm %s734_s11, 128  ;;  %s1150_s7 = scalar_lea.hbm %s1579_s3, 256 }
 0x15a   : > { %p1147_p1 = scmp.ne.s32.totalorder %s734_s11, %s1146_s26  ;;  %p1151_p6 = scmp.lt.s32.totalorder %s734_s11, %s1579_s3 }
 0x15b   : > { %p1152_p7 = scmp.lt.s32.totalorder %s1150_s7, %s1146_s26 }
 0x15c   : > { %p1148_p2 = pnand %p1147_p1, %p1335_p9 }
 0x15d   : > { %p1153_p8 = por %p1152_p7, %p1151_p6 }
 0x15e   : > { %p1149_p5 = pneg %p1148_p2 }
 0x160   : > { %p1154_p0 = pnand %p1153_p8, %p1149_p5 }
 0x162   : > { %1157 = shalt.err (!%p1154_p0)
}
 0x163   : > { %955 = dma.vmem_to_hbm [thread:$0]  (%p1335_p9), %s737_s23, 128, %s734_s11, %s717_s10   ;;  %vm683_vm7 = vcmp.eq.s32.totalorder %v1482_v5, 2  ;;  %vm686_vm8 = vcmp.eq.s32.totalorder %v1482_v5, 3 }
 0x164   : > { %s935_s21 = sshll.u32 %s1428_s6, 2  ;;  %s939_s27 = sshll.u32 %s1238_s18, 6 }
 0x165   : > { %s344_s13 = scalar_lea.vmem [#allocation15], %s935_s21  ;;  %s748_s29 = scalar_lea.hbm %s1580_s4, %s939_s27 }
 0x166   : > { %s750_s24 = sshll.u32 %s344_s13, 4  ;;  %s722_s25 = scalar_lea.sflag [#allocation16], %s1428_s6  ;;  %s751_s24 = int_to_ptr.vmem [resolvable:$true] %s750_s24 }
 0x167   : > { %s1158_s11 = scalar_lea.vmem %s751_s24, 64  ;;  %s1254_s10 = smov [#allocation15]  }
 0x168   : > { %p1159_p3 = scmp.ne.s32.totalorder %s751_s24, %s1158_s11  ;;  %s1162_s18 = sshll.u32 %s1254_s10, 4  ;;  %s1163_s18 = int_to_ptr.vmem [resolvable:$false] %s1162_s18 }
 0x169   : > { %s1164_s12 = scalar_lea.vmem %s1163_s18, 128  ;;  %p1165_p13 = scmp.lt.s32.totalorder %s751_s24, %s1163_s18 }
 0x16a   : > { %p1160_p4 = pnand %p1159_p3, %p1335_p9  ;;  %p1166_p12 = scmp.lt.s32.totalorder %s1164_s12, %s1158_s11 }
 0x16c   : > { %p1161_p10 = pneg %p1160_p4  ;;  %p1167_p1 = por %p1166_p12, %p1165_p13 }
 0x16e   : > { %p1168_p2 = pnand %p1167_p1, %p1161_p10 }
 0x179   : > { %v560_v28 = vpop.xlane.xlu0 %559  ;;  %v599_v16 = vpop.xlane.xlu1 %598 }
 0x17a   : > { %v681_v30 = vsel %vm680_vm6, %v599_v16, 0.0  ;;  %v679_v31 = vsel %vm678_vm5, %v560_v28, 0.0 }
 0x17b   : > { %v682_v33 = vadd.f32 %v681_v30, %v679_v31 }
 0x182   : > { %v638_v29 = vpop.xlane.xlu0 %637 }
 0x183   : > { %v684_v32 = vsel %vm683_vm7, %v638_v29, 0.0 }
 0x184   : > { %v685_v27 = vadd.f32 %v684_v32, %v682_v33 }
 0x18a   : > { %v677_v34 = vpop.xlane.xlu1 %676 }
 0x18b   : > { %v687_v35 = vsel %vm686_vm8, %v677_v34, 0.0 }
 0x18c   : > { %v688_v36 = vadd.f32 %v687_v35, %v685_v27 }
 0x18e   : > { %689 = vst [vmem:[%s344_s13] sm:$0xf] %v688_v36 }
 0x18f   : > { %1171 = shalt.err (!%p1168_p2)
}
 0x190   : > { %s1172_s30 = scalar_lea.hbm %s748_s29, 64  ;;  %s1176_s8 = scalar_lea.hbm %s1580_s4, 128 }
 0x191   : > { %p1173_p5 = scmp.ne.s32.totalorder %s748_s29, %s1172_s30  ;;  %p1177_p8 = scmp.lt.s32.totalorder %s748_s29, %s1580_s4 }
 0x192   : > { %p1178_p0 = scmp.lt.s32.totalorder %s1176_s8, %s1172_s30 }
 0x193   : > { %p1174_p6 = pnand %p1173_p5, %p1335_p9 }
 0x194   : > { %p1179_p3 = por %p1178_p0, %p1177_p8 }
 0x195   : > { %p1175_p7 = pneg %p1174_p6 }
 0x197   : > { %p1180_p4 = pnand %p1179_p3, %p1175_p7 }
 0x199   : > { %1183 = shalt.err (!%p1180_p4)
}
 0x19a   : > { %956 = dma.vmem_to_hbm [thread:$0]  (%p1335_p9), %s751_s24, 64, %s748_s29, %s722_s25  }
 0x19b PF: > { %s762_s7 = sand.u32 1, %s1226_s15   ;;  %p1602_p10 = scmp.ge.s32.totalorder %s1246_s20, 2 }
 0x19c   : > { %s763_s22 = scalar_lea.sflag [#allocation10], %s762_s7 }
 0x19d   : > { %p970_p13 = pnand %p1602_p10, %p1342_p11 }
 0x19f   : > { %p971_p12 = pneg %p970_p13 }
 0x1a1   : > { %1217 = dma.done.wait (%p971_p12), %s763_s22, 128  }
 0x1a2   : > { %1219 = vsyncadd (%p971_p12), %s763_s22, 4294967168  ;;  %s772_s9 = scalar_lea.sflag [#allocation16], %s762_s7 }
 0x1a3   : > { %1221 = dma.done.wait (%p971_p12), %s772_s9, 64  }
 0x1a4   : > { %1223 = vsyncadd (%p971_p12), %s772_s9, 4294967232  ;;  %s27_s20 = sadd.s32 1, %s1246_s20   ;;  %s1603_s28 = sld [smem:[#allocation23_spill]] }
 0x1a5   : > { %p24_p1 = scmp.ge.s32.totalorder %s27_s20, 4   ;;  %s1604_s18 = sld [smem:[#allocation21_spill]] }
 0x1a6   : > { %s1605_s19 = sld [smem:[#allocation22_spill]]  ;;  %s1606_s15 = smov %s1230_s16 }
 0x1a7   : > { %s1607_s16 = smov %s1234_s17  ;;  %26 = sbr.rel (!%p24_p1) target bundleno = 12 (0xc), region = 126 }
 0x1aa   : > { %s1608_s17 = smov %s1603_s28 }
 0x1ac   :  { %777 = vsyncpa [#allocation9], 1 }
 0x1ad   :  { %779 = vsyncpa [#allocation9 + $0x1], 1 }
 0x1ae   :  { %780 = vsyncpa [#allocation12], 1 }
 0x1af   :  { %782 = vsyncpa [#allocation12 + $0x1], 1 }
 0x1b0   :  { %783 = vsyncpa [#allocation10], 1 }
 0x1b1   :  { %785 = vsyncpa [#allocation10 + $0x1], 1 }
 0x1b2   :  { %786 = vsyncpa [#allocation16], 1 }
 0x1b3   :  { %788 = vsyncpa [#allocation16 + $0x1], 1 }

</bundles_post_ra>
